<compile_context>
chip_gen: v6e
topology: v6e:2x2x1
jax: 0.10.0
libtpu: 0.0.40
codegen_flags: <defaults>
</compile_context>

<pallas_src>
import functools

import jax
import jax.numpy as jnp
from jax.experimental import pallas as pl
from jax.experimental.pallas import tpu as pltpu

_TARGET_BLOCK_BYTES = 8 * 1024 * 1024   # ~8 MiB per input tile (x2 for double buffering)
_VMEM_LIMIT_BYTES = 32 * 1024 * 1024    # fits v5e/v6e (128 MiB phys) and v7x (64 MiB phys)


def _choose_tiles(rows, hw, dtype_bytes):
    """Pick (TR, THW): input block (TR, THW) ~<= _TARGET_BLOCK_BYTES, TPU (8,128)-legal."""
    row_bytes = hw * dtype_bytes
    max_rows = max(1, _TARGET_BLOCK_BYTES // row_bytes)
    if rows <= max_rows:
        return rows, hw                       # whole row extent fits in one block
    if max_rows >= 8:
        tr = (max_rows // 8) * 8              # multiple of 8 sublanes
        return min(tr, rows), hw
    # Even 8 rows x full HW exceeds the budget: split the HW (reduction) axis.
    tr = min(rows, 8)
    max_thw = max(128, _TARGET_BLOCK_BYTES // (tr * dtype_bytes))
    best = None
    k = 1
    while 128 * k <= min(hw, max_thw):
        if hw % (128 * k) == 0:               # exact divisor => no garbage in the reduction
            best = 128 * k
        k += 1
    if best is None:
        # TODO(synk): HW has no lane-aligned divisor within budget; fall back to full-HW blocks.
        return tr, hw
    return tr, best


def _concat_pool_kernel(x_ref, avg_ref, max_ref, sum_sc, max_sc, *, inv_hw):
    """Grid = (row tiles [parallel], HW tiles [arbitrary / reduction])."""
    k = pl.program_id(1)

    @pl.when(k == 0)
    def _init():
        sum_sc[...] = jnp.zeros_like(sum_sc)
        max_sc[...] = jnp.full_like(max_sc, -jnp.inf)

    x = x_ref[...]                                                     # (TR, THW)
    # f32 accumulation without materializing a full f32 copy of the tile.
    sum_sc[...] += jnp.sum(x, axis=-1, keepdims=True, dtype=jnp.float32)
    max_sc[...] = jnp.maximum(
        max_sc[...], jnp.max(x, axis=-1, keepdims=True).astype(jnp.float32))

    @pl.when(k == pl.num_programs(1) - 1)
    def _finalize():
        avg_ref[...] = (sum_sc[...] * inv_hw).astype(avg_ref.dtype)
        max_ref[...] = max_sc[...].astype(max_ref.dtype)


def adaptive_concat_pool2d(x):
    """x: (N, C, H, W) -> (N, 2*C, 1, 1), matching AdaptiveConcatPool2d(size=(1,1))."""
    N, C, H, W = x.shape
    rows, hw = N * C, H * W
    x2 = x.reshape(rows, hw)

    dtype_bytes = jnp.dtype(x.dtype).itemsize
    tr, thw = _choose_tiles(rows, hw, dtype_bytes)
    grid = (pl.cdiv(rows, tr), pl.cdiv(hw, thw))

    kernel = functools.partial(_concat_pool_kernel, inv_hw=float(1.0 / hw))

    avg2, max2 = pl.pallas_call(
        kernel,
        out_shape=(jax.ShapeDtypeStruct((rows, 1), x.dtype),
                   jax.ShapeDtypeStruct((rows, 1), x.dtype)),
        grid_spec=pltpu.PrefetchScalarGridSpec(
            num_scalar_prefetch=0,
            grid=grid,
            in_specs=[pl.BlockSpec((tr, thw), lambda i, k: (i, k))],
            out_specs=[pl.BlockSpec((tr, 1), lambda i, k: (i, 0)),
                       pl.BlockSpec((tr, 1), lambda i, k: (i, 0))],
            scratch_shapes=[pltpu.VMEM((tr, 1), jnp.float32),
                            pltpu.VMEM((tr, 1), jnp.float32)]),
        compiler_params=pltpu.CompilerParams(
            dimension_semantics=("parallel", "arbitrary"),
            vmem_limit_bytes=_VMEM_LIMIT_BYTES),
        cost_estimate=pl.CostEstimate(
            flops=2 * rows * hw,
            transcendentals=0,
            bytes_accessed=rows * hw * dtype_bytes + 2 * rows * dtype_bytes),
    )(x2)

    avg = avg2.reshape(N, C, 1, 1)
    mx = max2.reshape(N, C, 1, 1)
    return jnp.concatenate([avg, mx], axis=1)


if __name__ == "__main__":
    key = jax.random.PRNGKey(0)
    N, C, H, W = 2, 4, 16, 16
    x = jax.random.normal(key, (N, C, H, W), dtype=jnp.float32)

    out = adaptive_concat_pool2d(x)
    out = jax.block_until_ready(out)

    # Reference (same semantics as torch.cat([avgpool, maxpool], dim=1)).
    ref_avg = jnp.mean(x, axis=(2, 3), keepdims=True)
    ref_max = jnp.max(x, axis=(2, 3), keepdims=True)
    ref = jnp.concatenate([ref_avg, ref_max], axis=1)

    assert out.shape == (N, 2 * C, 1, 1), out.shape
    assert jnp.allclose(out, ref, atol=1e-5, rtol=1e-5), "mismatch vs reference"

    print("KERNEL_OK")
</pallas_src>

<mosaic_0001>
module attributes {stable_mosaic.version = 11 : i64} {
  func.func @_concat_pool_kernel(%arg0: i32, %arg1: i32, %arg2: memref<8x256xf32, #tpu.memory_space<vmem>>, %arg3: memref<8x1xf32, #tpu.memory_space<vmem>>, %arg4: memref<8x1xf32, #tpu.memory_space<vmem>>, %arg5: memref<8x1xf32, #tpu.memory_space<vmem>>, %arg6: memref<8x1xf32, #tpu.memory_space<vmem>>) attributes {dimension_semantics = [#tpu.dimension_semantics<parallel>, #tpu.dimension_semantics<arbitrary>], iteration_bounds = array<i64: 1, 1>, scalar_prefetch = 0 : i64, scratch_operands = 2 : i64, tpu.core_type = #tpu.core_type<tc>, window_params = [{transform_indices = @transform_0, window_bounds = array<i64: 8, 256>}, {transform_indices = @transform_1, window_bounds = array<i64: 8, 1>}, {transform_indices = @transform_2, window_bounds = array<i64: 8, 1>}]} {
    %c0_i32 = arith.constant 0 : i32
    %0 = arith.cmpi eq, %arg1, %c0_i32 : i32
    %1 = arith.extui %0 : i1 to i32
    %c0_i32_0 = arith.constant 0 : i32
    %2 = arith.cmpi ne, %1, %c0_i32_0 : i32
    scf.if %2 {
      %cst_13 = arith.constant 0.000000e+00 : f32
      %17 = vector.broadcast %cst_13 : f32 to vector<8x1xf32>
      %c0_14 = arith.constant 0 : index
      %c0_15 = arith.constant 0 : index
      %18 = vector.load %arg5[%c0_14, %c0_15] : memref<8x1xf32, #tpu.memory_space<vmem>>, vector<8x1xf32>
      tpu.vector_store %arg5[%c0_14, %c0_15], %17 {strides = array<i32>} : memref<8x1xf32, #tpu.memory_space<vmem>>, vector<8x1xf32>,
      %cst_16 = arith.constant 0xFF800000 : f32
      %19 = vector.broadcast %cst_16 : f32 to vector<8x1xf32>
      %c0_17 = arith.constant 0 : index
      %c0_18 = arith.constant 0 : index
      %20 = vector.load %arg6[%c0_17, %c0_18] : memref<8x1xf32, #tpu.memory_space<vmem>>, vector<8x1xf32>
      tpu.vector_store %arg6[%c0_17, %c0_18], %19 {strides = array<i32>} : memref<8x1xf32, #tpu.memory_space<vmem>>, vector<8x1xf32>,
    } else {
    }
    %c0 = arith.constant 0 : index
    %c0_1 = arith.constant 0 : index
    %3 = vector.load %arg2[%c0, %c0_1] : memref<8x256xf32, #tpu.memory_space<vmem>>, vector<8x256xf32>
    %c0_2 = arith.constant 0 : index
    %c0_3 = arith.constant 0 : index
    %4 = vector.load %arg5[%c0_2, %c0_3] : memref<8x1xf32, #tpu.memory_space<vmem>>, vector<8x1xf32>
    %cst = arith.constant dense<0.000000e+00> : vector<8xf32>
    %5 = vector.multi_reduction <add>, %3, %cst [1] : vector<8x256xf32> to vector<8xf32>
    %6 = vector.shape_cast %5 : vector<8xf32> to vector<8x1xf32>
    %7 = arith.addf %4, %6 : vector<8x1xf32>
    %c0_4 = arith.constant 0 : index
    %c0_5 = arith.constant 0 : index
    %8 = vector.load %arg5[%c0_4, %c0_5] : memref<8x1xf32, #tpu.memory_space<vmem>>, vector<8x1xf32>
    tpu.vector_store %arg5[%c0_4, %c0_5], %7 {strides = array<i32>} : memref<8x1xf32, #tpu.memory_space<vmem>>, vector<8x1xf32>,
    %c0_6 = arith.constant 0 : index
    %c0_7 = arith.constant 0 : index
    %9 = vector.load %arg6[%c0_6, %c0_7] : memref<8x1xf32, #tpu.memory_space<vmem>>, vector<8x1xf32>
    %cst_8 = arith.constant dense<0xFF800000> : vector<8xf32>
    %10 = vector.multi_reduction <maximumf>, %3, %cst_8 [1] : vector<8x256xf32> to vector<8xf32>
    %11 = vector.shape_cast %10 : vector<8xf32> to vector<8x1xf32>
    %12 = arith.maximumf %9, %11 : vector<8x1xf32>
    %c0_9 = arith.constant 0 : index
    %c0_10 = arith.constant 0 : index
    %13 = vector.load %arg6[%c0_9, %c0_10] : memref<8x1xf32, #tpu.memory_space<vmem>>, vector<8x1xf32>
    tpu.vector_store %arg6[%c0_9, %c0_10], %12 {strides = array<i32>} : memref<8x1xf32, #tpu.memory_space<vmem>>, vector<8x1xf32>,
    %c0_i32_11 = arith.constant 0 : i32
    %14 = arith.cmpi eq, %arg1, %c0_i32_11 : i32
    %15 = arith.extui %14 : i1 to i32
    %c0_i32_12 = arith.constant 0 : i32
    %16 = arith.cmpi ne, %15, %c0_i32_12 : i32
    scf.if %16 {
      %c0_13 = arith.constant 0 : index
      %c0_14 = arith.constant 0 : index
      %17 = vector.load %arg5[%c0_13, %c0_14] : memref<8x1xf32, #tpu.memory_space<vmem>>, vector<8x1xf32>
      %cst_15 = arith.constant 3.906250e-03 : f32
      %18 = vector.broadcast %cst_15 : f32 to vector<8x1xf32>
      %19 = arith.mulf %17, %18 : vector<8x1xf32>
      %c0_16 = arith.constant 0 : index
      %c0_17 = arith.constant 0 : index
      %20 = vector.load %arg3[%c0_16, %c0_17] : memref<8x1xf32, #tpu.memory_space<vmem>>, vector<8x1xf32>
      tpu.vector_store %arg3[%c0_16, %c0_17], %19 {strides = array<i32>} : memref<8x1xf32, #tpu.memory_space<vmem>>, vector<8x1xf32>,
      %c0_18 = arith.constant 0 : index
      %c0_19 = arith.constant 0 : index
      %21 = vector.load %arg6[%c0_18, %c0_19] : memref<8x1xf32, #tpu.memory_space<vmem>>, vector<8x1xf32>
      %c0_20 = arith.constant 0 : index
      %c0_21 = arith.constant 0 : index
      %22 = vector.load %arg4[%c0_20, %c0_21] : memref<8x1xf32, #tpu.memory_space<vmem>>, vector<8x1xf32>
      tpu.vector_store %arg4[%c0_20, %c0_21], %21 {strides = array<i32>} : memref<8x1xf32, #tpu.memory_space<vmem>>, vector<8x1xf32>,
    } else {
    }
    return
  }
  func.func @transform_0(%arg0: i32, %arg1: i32) -> (i32, i32) {
    %c0_i32 = arith.constant 0 : i32
    return %arg0, %arg1 : i32, i32
  }
  func.func @transform_1(%arg0: i32, %arg1: i32) -> (i32, i32) {
    %c0_i32 = arith.constant 0 : i32
    %c0_i32_0 = arith.constant 0 : i32
    return %arg0, %c0_i32 : i32, i32
  }
  func.func @transform_2(%arg0: i32, %arg1: i32) -> (i32, i32) {
    %c0_i32 = arith.constant 0 : i32
    %c0_i32_0 = arith.constant 0 : i32
    return %arg0, %c0_i32 : i32, i32
  }
}

</mosaic_0001>

<bundles_post_ra>
// kernel: tpu_custom_call.1
= control target key start
LH: loop header
LB: loop body
LE: loop exit
PB: predicated region body
PF: predicated region fallthrough
CT: control target
= control target key end

     0   :  { %8 = vsyncpa [#allocation5], 0  ;;  %s86_s9 = smov [#allocation4]   ;;  %s119_s0 = inlined_call_operand.hbm [shape: f32[8,256], index: 0, kind: input, shape index: {}]   ;;  %s120_s1 = inlined_call_operand.vmem [shape: f32[8,1], index: 1, kind: output, shape index: {0}]   ;;  %s121_s2 = inlined_call_operand.vmem [shape: f32[8,1], index: 2, kind: output, shape index: {1}]  }
   0x1   :  { %s15_s10 = sshll.u32 %s86_s9, 4  ;;  %s16_s10 = int_to_ptr.vmem [resolvable:$true] %s15_s10 }
   0x2   :  { %s72_s11 = scalar_lea.vmem %s16_s10, 256  ;;  %p77_p1 = scmp.lt.s32.totalorder %s16_s10, %s16_s10 }
   0x3   :  { %p73_p0 = scmp.ne.s32.totalorder %s16_s10, %s72_s11  ;;  %p78_p2 = scmp.lt.s32.totalorder %s72_s11, %s72_s11 }
   0x5   :  { %p79_p3 = por %p78_p2, %p77_p1 }
   0x7   :  { %p80_p4 = pnand %p79_p3, %p73_p0 }
   0x9   :  { %83 = shalt.err (!%p80_p4)
}
   0xa   :  { %18 = dma.hbm_to_vmem [thread:$0]  %s119_s0, 256, %s16_s10, [#allocation5]  }
   0xb   :  { %84 = dma.done.wait [#allocation5], 256  }
   0xc   :  { %85 = vsyncadd [#allocation5], 4294967040  ;;  %vm26_vm0 = vcmask 7168   ;;  %v87_v0 = vmov 0.0   ;;  %v29_v1 = vld [vmem:[#allocation4] sm:$0xff]  ;;  %v30_v2 = vld [vmem:[#allocation4 + $0x8] sm:$0xff] }
   0xd   :  { %27 = vst.msk [vmem:[#allocation2] sm:$0xff] %vm26_vm0, %v87_v0  ;;  %v32_v3 = vadd.f32 %v30_v2, %v29_v1  ;;  %v39_v4 = vmax.f32 %v29_v1, %v30_v2  ;;  %v88_v5 = vmov -inf  }
   0xe   :  { %28 = vst.msk [vmem:[#allocation3] sm:$0xff] %vm26_vm0, %v88_v5 }
   0xf   :  { %33 = vadd.xlane.f32.xlu0 %v32_v3 }
  0x13   :  { %40 = vmax.xlane.f32.xlu0 %v39_v4 }
  0x14   :  { %v31_v6 = vld [vmem:[#allocation2] sm:$0xff] }
  0x15   :  { %v38_v9 = vld [vmem:[#allocation3] sm:$0xff] }
  0x98   :  { %v34_v7 = vpop.xlane.xlu0 %33 }
  0x99   :  { %v35_v8 = vadd.f32 %v34_v7, %v31_v6 }
  0x9b   :  { %37 = vst.msk [vmem:[#allocation2] sm:$0xff] %vm26_vm0, %v35_v8 }
  0x9c   :  { %v41_v10 = vpop.xlane.xlu0 %40 }
  0x9d   :  { %v42_v11 = vmax.f32 %v38_v9, %v41_v10 }
  0x9f   :  { %43 = vst.msk [vmem:[#allocation3] sm:$0xff] %vm26_vm0, %v42_v11 }
  0xa2   :  { %v47_v12 = vld [vmem:[#allocation2] sm:$0xff] }
  0xa3   :  { %v48_v13 = vmul.f32 0.00390625, %v47_v12 }
  0xa5   :  { %49 = vst.msk [vmem:[%s120_s1] sm:$0xff] %vm26_vm0, %v48_v13 }
  0xa6   :  { %v50_v14 = vld [vmem:[#allocation3] sm:$0xff] }
  0xa7   :  { %51 = vst.msk [vmem:[%s121_s2] sm:$0xff] %vm26_vm0, %v50_v14 }
  0xa8   :  { %60 = vsyncpa [#allocation5], 1 }

</bundles_post_ra>
